<compile_context>
chip_gen: v5e
topology: v5e:2x2
jax: 0.10.0
libtpu: 0.0.40
codegen_flags: <defaults>
</compile_context>

<pallas_src>
import functools

import numpy as np

import jax
import jax.numpy as jnp
from jax import lax
from jax.experimental import pallas as pl
from jax.experimental.pallas import tpu as pltpu

_EPS = 1e-5
_LANE = 128


def approx_kernel(x_ref, w_ref, gb_ref, o_ref, h_ref, *,
                  P, num_layers, inp, transpose_out):
    N = x_ref.shape[0]
    eps = jnp.float32(_EPS)
    inv_n = jnp.float32(1.0 / N)

    # Build the zero-padded, lane-dense activation slab directly in VMEM
    # (replaces the wrapper-side pad + HBM round trip).
    h_ref[...] = jnp.zeros_like(h_ref)
    h_ref[:, :inp] = x_ref[...]

    def linear_bn(layer, h_in):
        # Linear.  Bias intentionally dropped: with train-mode BatchNorm right
        # after, the bias shifts y and the batch mean identically -> cancels.
        y = jnp.dot(h_in.astype(w_ref.dtype), w_ref[layer],
                    preferred_element_type=jnp.float32)
        # One-pass BatchNorm1d statistics (biased batch variance).
        s = jnp.sum(y, axis=0, keepdims=True)
        ss = jnp.sum(y * y, axis=0, keepdims=True)
        mean = s * inv_n
        var = jnp.maximum(ss * inv_n - mean * mean, 0.0)   # guard tiny negatives
        gb = gb_ref[layer]                                 # (2, F_pad)
        scale = gb[0:1, :] * lax.rsqrt(var + eps)          # rsqrt -> EUP slot
        shift = gb[1:2, :] - mean * scale
        return y * scale + shift                           # 2 VALU ops / elem

    def body(layer, h_in):                                 # layers 0 .. L-2
        return jnp.maximum(linear_bn(layer, h_in), 0.0)    # ReLU

    h = lax.fori_loop(0, num_layers - 1, body, h_ref[...])
    z = jnp.clip(linear_bn(num_layers - 1, h), 0.0, jnp.float32(P))

    if transpose_out:
        # Transpose on the (idle) XLU so only the useful columns hit HBM:
        # output is (oup, N), lane-dense along N.
        o_ref[...] = z.T[: o_ref.shape[0], :].astype(o_ref.dtype)
    else:
        o_ref[...] = z.astype(o_ref.dtype)


def pack_params(params, inp, weight_dtype=jnp.float32):
    """Pack the L layers' weights / BN params into two dense operands (ONCE).

    Returns:
      w_packed : (L, F_pad, F_pad) weight_dtype; zero-padded rows/cols keep the
                 padded feature lanes exactly 0 through every stage.
      gb_packed: (L, 2, F_pad) float32; [l, 0]=gamma (pad=1), [l, 1]=beta (pad=0).
    Linear biases are ignored (exact no-op under train-mode BatchNorm).
    Packing is pure numpy -> no per-call XLA .at[].set() ops.
    """
    L = len(params)
    max_dim = max([int(inp)] + [int(w.shape[1]) for (w, _b, _g, _be) in params])
    F_pad = _LANE * (-(-max_dim // _LANE))                 # round up to 128
    w_np = np.zeros((L, F_pad, F_pad), np.float32)
    gb_np = np.zeros((L, 2, F_pad), np.float32)
    for i, (w, _b, g, be) in enumerate(params):
        fi, fo = w.shape
        w_np[i, :fi, :fo] = np.asarray(w, np.float32)
        gb_np[i, 0, :] = 1.0                               # gamma padding = 1
        gb_np[i, 0, :fo] = np.asarray(g, np.float32).ravel()
        gb_np[i, 1, :fo] = np.asarray(be, np.float32).ravel()
    return jnp.asarray(w_np, weight_dtype), jnp.asarray(gb_np)


@functools.partial(jax.jit, static_argnames=("oup", "P"))
def approx_forward(x, w_packed, gb_packed, *, oup, P=1.0):
    """x: (N, inp) float32 (already flattened, as in Approx.forward).
    w_packed / gb_packed: outputs of pack_params (cached per parameter set)."""
    N, inp = x.shape
    L, F_pad, _ = w_packed.shape
    transpose_out = (N % 8 == 0)

    kernel = functools.partial(approx_kernel, P=float(P), num_layers=int(L),
                               inp=int(inp), transpose_out=transpose_out)

    if transpose_out:
        out_shape = jax.ShapeDtypeStruct((int(oup), N), jnp.float32)
        out_bytes = 4 * int(oup) * N
    else:
        out_shape = jax.ShapeDtypeStruct((N, F_pad), jnp.float32)
        out_bytes = 4 * N * F_pad

    # VMEM budget: single-buffered operands (grid=() => no pipelining), plus the
    # padded-activation scratch, ~3 live (N, F_pad) f32 intermediates (h/y/tmp),
    # output, and headroom.  Clamped below this generation's physical VMEM.
    w_bytes = w_packed.size * jnp.dtype(w_packed.dtype).itemsize
    vmem_bytes = (4 * x.size + w_bytes + 4 * gb_packed.size
                  + 4 * N * F_pad               # h scratch
                  + 3 * 4 * N * F_pad           # live intermediates
                  + out_bytes + (4 << 20))
    try:
        cap = int(pltpu.get_tpu_info().vmem_capacity_bytes) * 7 // 8
    except Exception:
        cap = 56 << 20                          # safe on v5e / v6e / v7x
    vmem_bytes = int(min(max(vmem_bytes, 16 << 20), cap))

    out = pl.pallas_call(
        kernel,
        out_shape=out_shape,
        in_specs=[pl.BlockSpec(memory_space=pltpu.MemorySpace.VMEM)] * 3,
        out_specs=pl.BlockSpec(memory_space=pltpu.MemorySpace.VMEM),
        scratch_shapes=[pltpu.VMEM((N, F_pad), jnp.float32)],
        compiler_params=pltpu.CompilerParams(vmem_limit_bytes=vmem_bytes),
    )(x.astype(jnp.float32), w_packed, gb_packed)

    if transpose_out:
        return out.T                            # (N, oup)
    return out[:, :oup]


def approx_reference(x, params, *, P=1.0):
    """Pure-JAX reference matching PyTorch train-mode semantics (bias included)."""
    eps = _EPS
    h = x.astype(jnp.float32)
    n_layers = len(params)
    for idx, (w, b, g, be) in enumerate(params):
        y = h @ w + b
        mean = jnp.mean(y, axis=0, keepdims=True)
        var = jnp.mean((y - mean) ** 2, axis=0, keepdims=True)
        y = (y - mean) / jnp.sqrt(var + eps) * g + be
        if idx < n_layers - 1:
            h = jnp.maximum(y, 0.0)
        else:
            h = jnp.clip(y, 0.0, P)
    return h


def init_params(key, inp=4, hidden=20, oup=2):
    """nn.Linear-style init (uniform +/- 1/sqrt(fan_in)); BN gamma=1, beta=0.
    Weights stored pre-transposed as (fan_in, fan_out)."""
    dims = [(inp, hidden), (hidden, hidden), (hidden, hidden),
            (hidden, hidden), (hidden, oup)]
    params = []
    for (fi, fo) in dims:
        key, kw, kb = jax.random.split(key, 3)
        bound = 1.0 / (fi ** 0.5)
        w = jax.random.uniform(kw, (fi, fo), jnp.float32, -bound, bound)
        b = jax.random.uniform(kb, (1, fo), jnp.float32, -bound, bound)
        gamma = jnp.ones((1, fo), jnp.float32)
        beta = jnp.zeros((1, fo), jnp.float32)
        params.append((w, b, gamma, beta))
    return params


if __name__ == "__main__":
    key = jax.random.PRNGKey(0)
    kx, kp = jax.random.split(key)

    N, inp, hidden, oup, P = 8, 4, 20, 2, 1.0
    # `Approx.forward` flattens h to (N, -1); default inp = 2**2 = 4 features.
    x = jax.random.normal(kx, (N, inp), jnp.float32)
    params = init_params(kp, inp=inp, hidden=hidden, oup=oup)

    # Pack once per parameter set (outside the per-call path).
    w_packed, gb_packed = pack_params(params, inp)

    out = approx_forward(x, w_packed, gb_packed, oup=oup, P=P)
    out = jax.block_until_ready(out)

    ref = approx_reference(x, params, P=P)
    assert out.shape == (N, oup), out.shape
    # One-pass variance + rsqrt introduce ~1e-6 level differences vs the
    # two-pass / sqrt reference; 1e-4 is a tight bound for a 5-layer net.
    assert jnp.allclose(out, ref, atol=1e-4, rtol=1e-4), (out, ref)

    print("KERNEL_OK")
</pallas_src>

<mosaic_0001>
module attributes {stable_mosaic.version = 11 : i64} {
  func.func @approx_kernel(%arg0: memref<8x4xf32, #tpu.memory_space<vmem>>, %arg1: memref<5x128x128xf32, #tpu.memory_space<vmem>>, %arg2: memref<5x2x128xf32, #tpu.memory_space<vmem>>, %arg3: memref<2x8xf32, #tpu.memory_space<vmem>>, %arg4: memref<8x128xf32, #tpu.memory_space<vmem>>) attributes {dimension_semantics = [], scalar_prefetch = 0 : i64, scratch_operands = 1 : i64, tpu.core_type = #tpu.core_type<tc>} {
    %cst = arith.constant 0.000000e+00 : f32
    %0 = vector.broadcast %cst : f32 to vector<8x128xf32>
    %c0 = arith.constant 0 : index
    %c0_0 = arith.constant 0 : index
    %1 = vector.load %arg4[%c0, %c0_0] : memref<8x128xf32, #tpu.memory_space<vmem>>, vector<8x128xf32>
    tpu.vector_store %arg4[%c0, %c0_0], %0 {strides = array<i32>} : memref<8x128xf32, #tpu.memory_space<vmem>>, vector<8x128xf32>,
    %c0_1 = arith.constant 0 : index
    %c0_2 = arith.constant 0 : index
    %2 = vector.load %arg0[%c0_1, %c0_2] : memref<8x4xf32, #tpu.memory_space<vmem>>, vector<8x4xf32>
    %c0_3 = arith.constant 0 : index
    %c0_4 = arith.constant 0 : index
    %3 = vector.load %arg4[%c0_3, %c0_4] : memref<8x128xf32, #tpu.memory_space<vmem>>, vector<8x4xf32>
    tpu.vector_store %arg4[%c0_3, %c0_4], %2 {strides = array<i32>} : memref<8x128xf32, #tpu.memory_space<vmem>>, vector<8x4xf32>,
    %c0_5 = arith.constant 0 : index
    %c0_6 = arith.constant 0 : index
    %4 = vector.load %arg4[%c0_5, %c0_6] : memref<8x128xf32, #tpu.memory_space<vmem>>, vector<8x128xf32>
    %cst_7 = arith.constant 1.250000e-01 : f32
    %cst_8 = arith.constant 9.99999974E-6 : f32
    %c0_i32 = arith.constant 0 : i32
    %c4_i32 = arith.constant 4 : i32
    %5 = arith.addi %c0_i32, %c4_i32 : i32
    %c1_i32 = arith.constant 1 : i32
    %6 = scf.for %arg5 = %c0_i32 to %5 step %c1_i32 iter_args(%arg6 = %4) -> (vector<8x128xf32>)  : i32 {
      %44 = arith.index_cast %arg5 : i32 to index
      %c0_26 = arith.constant 0 : index
      %c0_27 = arith.constant 0 : index
      %45 = vector.load %arg1[%44, %c0_26, %c0_27] : memref<5x128x128xf32, #tpu.memory_space<vmem>>, vector<1x128x128xf32>
      %46 = vector.shape_cast %45 : vector<1x128x128xf32> to vector<128x128xf32>
      %cst_28 = arith.constant dense<0.000000e+00> : vector<8x128xf32>
      %47 = tpu.matmul %arg6, %46, %cst_28 {dimension_numbers = #tpu.dot_dimension_numbers<[1], [0], [0], [1], [0, 0, 1, 1], [], []>} : vector<8x128xf32>, vector<128x128xf32>, vector<8x128xf32> -> vector<8x128xf32>
      %cst_29 = arith.constant dense<0.000000e+00> : vector<128xf32>
      %48 = vector.multi_reduction <add>, %47, %cst_29 [0] : vector<8x128xf32> to vector<128xf32>
      %49 = vector.shape_cast %48 : vector<128xf32> to vector<1x128xf32>
      %50 = arith.mulf %47, %47 : vector<8x128xf32>
      %cst_30 = arith.constant dense<0.000000e+00> : vector<128xf32>
      %51 = vector.multi_reduction <add>, %50, %cst_30 [0] : vector<8x128xf32> to vector<128xf32>
      %52 = vector.shape_cast %51 : vector<128xf32> to vector<1x128xf32>
      %53 = vector.broadcast %cst_7 : f32 to vector<1x128xf32>
      %54 = arith.mulf %49, %53 : vector<1x128xf32>
      %55 = vector.broadcast %cst_7 : f32 to vector<1x128xf32>
      %56 = arith.mulf %52, %55 : vector<1x128xf32>
      %57 = arith.mulf %54, %54 : vector<1x128xf32>
      %58 = arith.subf %56, %57 : vector<1x128xf32>
      %cst_31 = arith.constant 0.000000e+00 : f32
      %59 = vector.broadcast %cst_31 : f32 to vector<1x128xf32>
      %60 = arith.maximumf %58, %59 : vector<1x128xf32>
      %61 = arith.index_cast %arg5 : i32 to index
      %c0_32 = arith.constant 0 : index
      %c0_33 = arith.constant 0 : index
      %62 = vector.load %arg2[%61, %c0_32, %c0_33] : memref<5x2x128xf32, #tpu.memory_space<vmem>>, vector<1x2x128xf32>
      %63 = vector.shape_cast %62 : vector<1x2x128xf32> to vector<2x128xf32>
      %64 = vector.extract_strided_slice %63 {offsets = [0, 0], sizes = [1, 128], strides = [1, 1]} : vector<2x128xf32> to vector<1x128xf32>
      %65 = vector.broadcast %cst_8 : f32 to vector<1x128xf32>
      %66 = arith.addf %60, %65 : vector<1x128xf32>
      %67 = math.rsqrt %66 : vector<1x128xf32>
      %68 = arith.mulf %64, %67 : vector<1x128xf32>
      %69 = vector.extract_strided_slice %63 {offsets = [1, 0], sizes = [1, 128], strides = [1, 1]} : vector<2x128xf32> to vector<1x128xf32>
      %70 = arith.mulf %54, %68 : vector<1x128xf32>
      %71 = arith.subf %69, %70 : vector<1x128xf32>
      %72 = vector.broadcast %68 : vector<1x128xf32> to vector<8x128xf32>
      %73 = arith.mulf %47, %72 : vector<8x128xf32>
      %74 = vector.broadcast %71 : vector<1x128xf32> to vector<8x128xf32>
      %75 = arith.addf %73, %74 : vector<8x128xf32>
      %cst_34 = arith.constant 0.000000e+00 : f32
      %76 = vector.broadcast %cst_34 : f32 to vector<8x128xf32>
      %77 = arith.maximumf %75, %76 : vector<8x128xf32>
      scf.yield %77 : vector<8x128xf32>
    }
    %c4_i32_9 = arith.constant 4 : i32
    %c4 = arith.constant 4 : index
    %c0_10 = arith.constant 0 : index
    %c0_11 = arith.constant 0 : index
    %7 = vector.load %arg1[%c4, %c0_10, %c0_11] : memref<5x128x128xf32, #tpu.memory_space<vmem>>, vector<1x128x128xf32>
    %8 = vector.shape_cast %7 : vector<1x128x128xf32> to vector<128x128xf32>
    %cst_12 = arith.constant dense<0.000000e+00> : vector<8x128xf32>
    %9 = tpu.matmul %6, %8, %cst_12 {dimension_numbers = #tpu.dot_dimension_numbers<[1], [0], [0], [1], [0, 0, 1, 1], [], []>} : vector<8x128xf32>, vector<128x128xf32>, vector<8x128xf32> -> vector<8x128xf32>
    %cst_13 = arith.constant dense<0.000000e+00> : vector<128xf32>
    %10 = vector.multi_reduction <add>, %9, %cst_13 [0] : vector<8x128xf32> to vector<128xf32>
    %11 = vector.shape_cast %10 : vector<128xf32> to vector<1x128xf32>
    %12 = arith.mulf %9, %9 : vector<8x128xf32>
    %cst_14 = arith.constant dense<0.000000e+00> : vector<128xf32>
    %13 = vector.multi_reduction <add>, %12, %cst_14 [0] : vector<8x128xf32> to vector<128xf32>
    %14 = vector.shape_cast %13 : vector<128xf32> to vector<1x128xf32>
    %cst_15 = arith.constant 1.250000e-01 : f32
    %15 = vector.broadcast %cst_15 : f32 to vector<1x128xf32>
    %16 = arith.mulf %11, %15 : vector<1x128xf32>
    %cst_16 = arith.constant 1.250000e-01 : f32
    %17 = vector.broadcast %cst_16 : f32 to vector<1x128xf32>
    %18 = arith.mulf %14, %17 : vector<1x128xf32>
    %19 = arith.mulf %16, %16 : vector<1x128xf32>
    %20 = arith.subf %18, %19 : vector<1x128xf32>
    %cst_17 = arith.constant 0.000000e+00 : f32
    %21 = vector.broadcast %cst_17 : f32 to vector<1x128xf32>
    %22 = arith.maximumf %20, %21 : vector<1x128xf32>
    %c4_18 = arith.constant 4 : index
    %c0_19 = arith.constant 0 : index
    %c0_20 = arith.constant 0 : index
    %23 = vector.load %arg2[%c4_18, %c0_19, %c0_20] : memref<5x2x128xf32, #tpu.memory_space<vmem>>, vector<1x2x128xf32>
    %24 = vector.shape_cast %23 : vector<1x2x128xf32> to vector<2x128xf32>
    %25 = vector.extract_strided_slice %24 {offsets = [0, 0], sizes = [1, 128], strides = [1, 1]} : vector<2x128xf32> to vector<1x128xf32>
    %cst_21 = arith.constant 9.99999974E-6 : f32
    %26 = vector.broadcast %cst_21 : f32 to vector<1x128xf32>
    %27 = arith.addf %22, %26 : vector<1x128xf32>
    %28 = math.rsqrt %27 : vector<1x128xf32>
    %29 = arith.mulf %25, %28 : vector<1x128xf32>
    %30 = vector.extract_strided_slice %24 {offsets = [1, 0], sizes = [1, 128], strides = [1, 1]} : vector<2x128xf32> to vector<1x128xf32>
    %31 = arith.mulf %16, %29 : vector<1x128xf32>
    %32 = arith.subf %30, %31 : vector<1x128xf32>
    %33 = vector.broadcast %29 : vector<1x128xf32> to vector<8x128xf32>
    %34 = arith.mulf %9, %33 : vector<8x128xf32>
    %35 = vector.broadcast %32 : vector<1x128xf32> to vector<8x128xf32>
    %36 = arith.addf %34, %35 : vector<8x128xf32>
    %cst_22 = arith.constant 0.000000e+00 : f32
    %cst_23 = arith.constant 1.000000e+00 : f32
    %37 = vector.broadcast %cst_22 : f32 to vector<8x128xf32>
    %38 = arith.maximumf %37, %36 : vector<8x128xf32>
    %39 = vector.broadcast %cst_23 : f32 to vector<8x128xf32>
    %40 = arith.minimumf %39, %38 : vector<8x128xf32>
    %41 = tpu.transpose %40, [1, 0] : vector<8x128xf32> -> vector<128x8xf32>
    %42 = vector.extract_strided_slice %41 {offsets = [0, 0], sizes = [2, 8], strides = [1, 1]} : vector<128x8xf32> to vector<2x8xf32>
    %c0_24 = arith.constant 0 : index
    %c0_25 = arith.constant 0 : index
    %43 = vector.load %arg3[%c0_24, %c0_25] : memref<2x8xf32, #tpu.memory_space<vmem>>, vector<2x8xf32>
    tpu.vector_store %arg3[%c0_24, %c0_25], %42 {strides = array<i32>} : memref<2x8xf32, #tpu.memory_space<vmem>>, vector<2x8xf32>,
    return
  }
}

</mosaic_0001>

<bundles_post_ra>
// kernel: approx_forward.1
= control target key start
LH: loop header
LB: loop body
LE: loop exit
PB: predicated region body
PF: predicated region fallthrough
CT: control target
= control target key end

     0   :  { %8 = vsyncpa [#allocation4], 0  ;;  %s418_s0 = inlined_call_operand.vmem [shape: f32[8,4], index: 0, kind: input, shape index: {}]   ;;  %s419_s1 = inlined_call_operand.hbm [shape: f32[5,128,128], index: 1, kind: input, shape index: {}]   ;;  %s420_s2 = inlined_call_operand.vmem [shape: f32[5,2,128], index: 2, kind: input, shape index: {}]   ;;  %s421_s3 = inlined_call_operand.hbm [shape: f32[2,8], index: 3, kind: output, shape index: {}]  }
   0x1   :  { %9 = vsyncpa [#allocation5], 0  ;;  %s16_s14 = sshll.u32 %s419_s1, 4  ;;  %s363_s15 = smov [#allocation3]   ;;  %s17_s14 = int_to_ptr.hbm [resolvable:$true] %s16_s14 }
   0x2   :  { %s18_s16 = sshll.u32 %s363_s15, 4  ;;  %s364_s17 = smov 128   ;;  %s19_s16 = int_to_ptr.vmem [resolvable:$true] %s18_s16 }
   0x3   :  { %s365_s18 = smov 8  }
   0x4   :  { %24 = dma.hbm_to_vmem [thread:$0]  %s17_s14, 10240, %s19_s16, [#allocation4], %s364_s17, %s364_s17, %s365_s18  }
   0x5   :  { %351 = dma.done.wait [#allocation4], 10240  }
   0x6   :  { %352 = vsyncadd [#allocation4], 4294957056  ;;  %v366_v0 = vmov 0.0   ;;  %vm33_vm0 = vcmask 31744   ;;  %v32_v1 = vld [vmem:[%s418_s0] sm:$0xff]  ;;  %s396_s1 = smov 0  }
   0x7   :  { %31 = vst [vmem:[#allocation2] sm:$0xff] %v366_v0 }
   0x8   :  { %34 = vst.msk [vmem:[#allocation2] sm:$0xff] %vm33_vm0, %v32_v1 }
   0xf   :  { %v35_v2 = vld [vmem:[#allocation2] sm:$0xff]  }
  0x10 LB: > { %s267_s21 = sshll.u32 %s361_s1, 7  ;;  %s268_s0 = sshll.u32 %s361_s1, 1  ;;  %s361_s1 = sphi %s396_s1, %s41_s1   ;;  %v357_v2 = vphi %v35_v2, %v422_v2  }
  0x11   : > { %s44_s22 = scalar_lea.vmem [#allocation3], %s267_s21  ;;  %s100_s25 = scalar_lea.vmem %s420_s2, %s268_s0 }
  0x12   : > { %v60_v3 = vld [vmem:[%s44_s22 + $0x78] sm:$0xff]  ;;  %v59_v4 = vld [vmem:[%s44_s22 + $0x70] sm:$0xff]  ;;  %v58_v5 = vld [vmem:[%s44_s22 + $0x68] sm:$0xff]  ;;  %s41_s1 = sadd.s32 1, %s361_s1  }
  0x13   : > { %61 = vmatpush.msra.mxu0 %v60_v3  ;;  %v57_v6 = vld [vmem:[%s44_s22 + $0x60] sm:$0xff]  ;;  %v56_v7 = vld [vmem:[%s44_s22 + $0x58] sm:$0xff]  ;;  %v55_v8 = vld [vmem:[%s44_s22 + $0x50] sm:$0xff]  ;;  %p38_p0 = scmp.ge.s32.totalorder %s41_s1, 4  }
  0x14   : > { %v54_v9 = vld [vmem:[%s44_s22 + $0x48] sm:$0xff]  ;;  %v53_v10 = vld [vmem:[%s44_s22 + $0x40] sm:$0xff]  ;;  %v52_v11 = vld [vmem:[%s44_s22 + $0x38] sm:$0xff]  ;;  %s367_s28 = smov (%p38_p0), [#allocation6]   ;;  %vm236_vm7 = vcmask (%p38_p0), 58368  }
  0x15   : > { %62 = vmatpush.msra.mxu0 %v59_v4  ;;  %v51_v12 = vld [vmem:[%s44_s22 + $0x30] sm:$0xff]  ;;  %v50_v13 = vld [vmem:[%s44_s22 + $0x28] sm:$0xff]  ;;  %v49_v14 = vld [vmem:[%s44_s22 + $0x20] sm:$0xff]  ;;  %s243_s29 = sshll.u32 (%p38_p0), %s367_s28, 4  ;;  %s244_s29 = int_to_ptr.vmem [resolvable:$true] %s243_s29 }
  0x16   : > { %v48_v15 = vld [vmem:[%s44_s22 + $0x18] sm:$0xff]  ;;  %v47_v16 = vld [vmem:[%s44_s22 + $0x10] sm:$0xff]  ;;  %v46_v17 = vld [vmem:[%s44_s22 + $0x8] sm:$0xff] }
  0x17   : > { %63 = vmatpush.msra.mxu0 %v58_v5  ;;  %v45_v18 = vld [vmem:[%s44_s22] sm:$0xff]  ;;  %v139_v57 = vld [vmem:[#allocation3 + $0x270] sm:$0xff] (%p38_p0)  ;;  %v138_v58 = vld [vmem:[#allocation3 + $0x268] sm:$0xff] (%p38_p0) }
  0x18   : > { %v101_v44 = vld [vmem:[%s100_s25] sm:$0x3]  ;;  %v137_v59 = vld [vmem:[#allocation3 + $0x260] sm:$0xff] (%p38_p0)  ;;  %v135_v61 = vld [vmem:[#allocation3 + $0x250] sm:$0xff] (%p38_p0) }
  0x19   : > { %64 = vmatpush.msra.mxu0 %v57_v6  ;;  %v140_v56 = vld [vmem:[#allocation3 + $0x278] sm:$0xff] (%p38_p0)  ;;  %v134_v62 = vld [vmem:[#allocation3 + $0x248] sm:$0xff] (%p38_p0)  ;;  %v133_v63 = vld [vmem:[#allocation3 + $0x240] sm:$0xff] (%p38_p0) }
  0x1a   :  { %v136_v60 = vld [vmem:[#allocation3 + $0x258] sm:$0xff] (%p38_p0)  ;;  %v131_v1 = vld [vmem:[#allocation3 + $0x230] sm:$0xff] (%p38_p0)  ;;  %v129_v3 = vld [vmem:[#allocation3 + $0x220] sm:$0xff] (%p38_p0) }
  0x1b   : > { %65 = vmatpush.msra.mxu0 %v56_v7  ;;  %v132_v0 = vld [vmem:[#allocation3 + $0x238] sm:$0xff] (%p38_p0)  ;;  %v127_v5 = vld [vmem:[#allocation3 + $0x210] sm:$0xff] (%p38_p0)  ;;  %v126_v6 = vld [vmem:[#allocation3 + $0x208] sm:$0xff] (%p38_p0) }
  0x1c   :  { %v128_v4 = vld [vmem:[#allocation3 + $0x218] sm:$0xff] (%p38_p0)  ;;  %v125_v7 = vld [vmem:[#allocation3 + $0x200] sm:$0xff] (%p38_p0) }
  0x1d   : > { %66 = vmatpush.msra.mxu0 %v55_v8 }
  0x1f   : > { %67 = vmatpush.msra.mxu0 %v54_v9 }
  0x21   : > { %68 = vmatpush.msra.mxu0 %v53_v10 }
  0x23   : > { %69 = vmatpush.msra.mxu0 %v52_v11 }
  0x25   : > { %70 = vmatpush.msra.mxu0 %v51_v12 }
  0x27   : > { %71 = vmatpush.msra.mxu0 %v50_v13 }
  0x29   : > { %72 = vmatpush.msra.mxu0 %v49_v14 }
  0x2b   : > { %73 = vmatpush.msra.mxu0 %v48_v15 }
  0x2d   : > { %74 = vmatpush.msra.mxu0 %v47_v16 }
  0x2f   : > { %75 = vmatpush.msra.mxu0 %v46_v17 }
  0x31   : > { %76 = vmatpush.msra.mxu0 %v45_v18 }
  0x32   : > { %77 = vmatmul.f32.vlgmr.msra.gmra.mxu0 %v357_v2 }
  0x33   :  { %141 = vmatpush.msra.mxu0 (%p38_p0), %v140_v56 }
  0x35   :  { %142 = vmatpush.msra.mxu0 (%p38_p0), %v139_v57 }
  0x37   :  { %143 = vmatpush.msra.mxu0 (%p38_p0), %v138_v58 }
  0x39   :  { %144 = vmatpush.msra.mxu0 (%p38_p0), %v137_v59 }
  0x3b   :  { %145 = vmatpush.msra.mxu0 (%p38_p0), %v136_v60 }
  0x3d   :  { %146 = vmatpush.msra.mxu0 (%p38_p0), %v135_v61 }
  0x3f   :  { %147 = vmatpush.msra.mxu0 (%p38_p0), %v134_v62 }
  0x41   :  { %148 = vmatpush.msra.mxu0 (%p38_p0), %v133_v63 }
  0x43   :  { %149 = vmatpush.msra.mxu0 (%p38_p0), %v132_v0 }
  0x45   :  { %150 = vmatpush.msra.mxu0 (%p38_p0), %v131_v1 }
  0xaf   : > { %v78_v19 = vpop.f32.mrf.mxu0 }
  0xb0   : > { %v81_v20 = vrot.slane %v78_v19, 4  ;;  %v87_v21 = vmul.f32 %v78_v19, %v78_v19 }
  0xb2   : > { %v82_v22 = vadd.f32 %v81_v20, %v78_v19  ;;  %v88_v23 = vrot.slane %v87_v21, 4 }
  0xb4   : > { %v83_v24 = vrot.slane %v82_v22, 2  ;;  %v89_v25 = vadd.f32 %v88_v23, %v87_v21 }
  0xb6   : > { %v84_v26 = vadd.f32 %v83_v24, %v82_v22  ;;  %v90_v27 = vrot.slane %v89_v25, 2 }
  0xb8   : > { %v85_v28 = vrot.slane %v84_v26, 1  ;;  %v91_v29 = vadd.f32 %v90_v27, %v89_v25 }
  0xba   : > { %v86_v30 = vadd.f32 %v85_v28, %v84_v26  ;;  %v92_v31 = vrot.slane %v91_v29, 1 }
  0xbc   : > { %v93_v32 = vadd.f32 %v92_v31, %v91_v29  ;;  %v94_v33 = vmul.f32 0.125, %v86_v30 }
  0xbe   : > { %v95_v34 = vmul.f32 0.125, %v93_v32  ;;  %v96_v35 = vmul.f32 %v94_v33, %v94_v33 }
  0xc0   : > { %v97_v36 = vsub.f32 %v95_v34, %v96_v35 }
  0xc2   : > { %v98_v37 = vmax.f32 %v97_v36, 0.0 }
  0xc4   : > { %v102_v38 = vadd.f32 1e-05, %v98_v37 }
  0xc6   : > { %291 = vrsqrt.f32 %v102_v38  ;;  %vm109_vm2 = vweird.f32 %v102_v38 }
  0xcc   : > { %v292_v39 = vpop.eup %291 }
  0xcd   : > { %v104_v40 = vmul.f32 %v292_v39, %v102_v38  ;;  %vm110_vm1 = vweird.f32 %v292_v39 }
  0xce   : > { %vm111_vm3 = vmor %vm109_vm2, %vm110_vm1 }
  0xcf   : > { %v105_v41 = vmul.f32 %v292_v39, %v104_v40 }
  0xd1   : > { %v106_v42 = vmul.f32 0.5, %v105_v41 }
  0xd3   : > { %v107_v43 = vsub.f32 1.5, %v106_v42 }
  0xd5   : > { %v108_v45 = vmul.f32 %v292_v39, %v107_v43 }
  0xd7   : > { %v112_v46 = vsel %vm111_vm3, %v292_v39, %v108_v45 }
  0xd8   : > { %v113_v47 = vmul.f32 %v112_v46, %v101_v44 }
  0xda   : > { %v114_v48 = vmul.f32 %v113_v47, %v94_v33  ;;  %v119_v50 = vperm.slane %v113_v47, 0  ;;  %v269_v33 = vld [vmem:[%s420_s2 + $0x8] sm:$0x3] (%p38_p0)  ;;  %s245_s2 = sshll.u32 (%p38_p0), %s421_s3, 4  ;;  %s246_s2 = int_to_ptr.hbm [resolvable:$true] %s245_s2 }
  0xdc   : > { %v116_v49 = vrot.slane %v114_v48, 7  ;;  %v120_v52 = vmul.f32 %v119_v50, %v78_v19 }
  0xde   : > { %v118_v51 = vsub.f32 %v101_v44, %v116_v49 }
  0xe0   : > { %v121_v53 = vperm.slane %v118_v51, 1 }
  0xe2   : > { %v122_v54 = vadd.f32 %v121_v53, %v120_v52  ;;  %40 = sbr.rel (!%p38_p0) target bundleno = 16 (0x10), region = 47 }
  0xe4   : > { %v123_v55 = vmax.f32 %v122_v54, 0.0  }
  0xe6   : > { %v422_v2 = vmov %v123_v55 }
  0xe7   :  { %v130_v2 = vld [vmem:[#allocation3 + $0x228] sm:$0xff] }
  0xe8   :  { %151 = vmatpush.msra.mxu0 %v130_v2 }
  0xea   :  { %152 = vmatpush.msra.mxu0 %v129_v3 }
  0xec   :  { %153 = vmatpush.msra.mxu0 %v128_v4 }
  0xee   :  { %154 = vmatpush.msra.mxu0 %v127_v5 }
  0xf0   :  { %155 = vmatpush.msra.mxu0 %v126_v6 }
  0xf2   :  { %156 = vmatpush.msra.mxu0 %v125_v7 }
  0xf3   :  { %157 = vmatmul.f32.vlgmr.msra.gmra.mxu0 %v123_v55 }
 0x170   :  { %v158_v8 = vpop.f32.mrf.mxu0 }
 0x171   :  { %v161_v9 = vrot.slane %v158_v8, 4  ;;  %v167_v10 = vmul.f32 %v158_v8, %v158_v8 }
 0x173   :  { %v162_v11 = vadd.f32 %v161_v9, %v158_v8  ;;  %v168_v12 = vrot.slane %v167_v10, 4 }
 0x175   :  { %v163_v13 = vrot.slane %v162_v11, 2  ;;  %v169_v14 = vadd.f32 %v168_v12, %v167_v10 }
 0x177   :  { %v164_v15 = vadd.f32 %v163_v13, %v162_v11  ;;  %v170_v16 = vrot.slane %v169_v14, 2 }
 0x179   :  { %v165_v17 = vrot.slane %v164_v15, 1  ;;  %v171_v18 = vadd.f32 %v170_v16, %v169_v14 }
 0x17b   :  { %v166_v19 = vadd.f32 %v165_v17, %v164_v15  ;;  %v172_v20 = vrot.slane %v171_v18, 1 }
 0x17d   :  { %v173_v21 = vadd.f32 %v172_v20, %v171_v18  ;;  %v174_v22 = vmul.f32 0.125, %v166_v19 }
 0x17f   :  { %v175_v23 = vmul.f32 0.125, %v173_v21  ;;  %v176_v24 = vmul.f32 %v174_v22, %v174_v22 }
 0x181   :  { %v177_v25 = vsub.f32 %v175_v23, %v176_v24 }
 0x183   :  { %v178_v26 = vmax.f32 %v177_v25, 0.0 }
 0x185   :  { %v181_v27 = vadd.f32 1e-05, %v178_v26 }
 0x187   :  { %293 = vrsqrt.f32 %v181_v27  ;;  %vm188_vm5 = vweird.f32 %v181_v27 }
 0x18d   :  { %v294_v28 = vpop.eup %293 }
 0x18e   :  { %v183_v29 = vmul.f32 %v294_v28, %v181_v27  ;;  %vm189_vm4 = vweird.f32 %v294_v28 }
 0x18f   :  { %vm190_vm6 = vmor %vm188_vm5, %vm189_vm4 }
 0x190   :  { %v184_v30 = vmul.f32 %v294_v28, %v183_v29 }
 0x192   :  { %v185_v31 = vmul.f32 0.5, %v184_v30 }
 0x194   :  { %v186_v32 = vsub.f32 1.5, %v185_v31 }
 0x196   :  { %v187_v34 = vmul.f32 %v294_v28, %v186_v32 }
 0x198   :  { %v191_v35 = vsel %vm190_vm6, %v294_v28, %v187_v34 }
 0x199   :  { %v192_v36 = vmul.f32 %v269_v33, %v191_v35 }
 0x19b   :  { %v193_v37 = vmul.f32 %v192_v36, %v174_v22  ;;  %v198_v39 = vperm.slane %v192_v36, 0 }
 0x19d   :  { %v195_v38 = vrot.slane %v193_v37, 7  ;;  %v199_v41 = vmul.f32 %v198_v39, %v158_v8 }
 0x19f   :  { %v197_v40 = vsub.f32 %v269_v33, %v195_v38 }
 0x1a1   :  { %v200_v42 = vperm.slane %v197_v40, 1 }
 0x1a3   :  { %v201_v43 = vadd.f32 %v200_v42, %v199_v41 }
 0x1a5   :  { %v202_v44 = vmax.f32 %v201_v43, 0.0 }
 0x1a7   :  { %v203_v45 = vmin.f32 %v202_v44, 1.0 }
 0x1a9   :  { %204 = vxpose.xlu0.b32.start.end [1/1] (short) (narrow) %v203_v45, 8 }
 0x24d   :  { %v220_v46 = vpop.trf.xlu0 }
 0x24e   :  { %237 = vst.msk [vmem:[#allocation6] sm:$0x3] %vm236_vm7, %v220_v46 }
 0x24f   :  { %248 = dma.vmem_to_hbm [thread:$0]  %s244_s29, 32, %s246_s2, [#allocation5]  }
 0x250   :  { %353 = dma.done.wait [#allocation5], 32  }
 0x251   :  { %354 = vsyncadd [#allocation5], 4294967264 }
 0x252   :  { %253 = vsyncpa [#allocation4], 1 }
 0x253   :  { %254 = vsyncpa [#allocation5], 1 }

</bundles_post_ra>
